<compile_context>
chip_gen: v7x
topology: tpu7x:2x2x1
jax: 0.10.0
libtpu: 0.0.40
codegen_flags: <defaults>
</compile_context>

<pallas_src>
import functools

import jax
import jax.numpy as jnp
from jax.experimental import pallas as pl
from jax.experimental.pallas import tpu as pltpu


# ---------------------------------------------------------------------------
# Out-of-place (copy) path
# ---------------------------------------------------------------------------
def _assemble_kernel(ctx_ref, emb_ref, out_ref, *, n_ctx):
    # ctx_ref: (n_ctx, D)      learned generic context (shared across classes)
    # emb_ref: (C_BLK, S, D)   frozen token embedding block
    # out_ref: (C_BLK, S, D)
    c_blk, _, d = out_ref.shape
    # Full-tile, lane/sublane-dense copy of the frozen embedding.
    out_ref[...] = emb_ref[...]
    # Single masked overwrite of the learned context rows (row offset 1),
    # broadcast over the class block. ctx is already in out dtype (wrapper cast).
    out_ref[:, pl.ds(1, n_ctx), :] = jnp.broadcast_to(
        ctx_ref[...][None, :, :], (c_blk, n_ctx, d)
    )


def _vmem_budget_bytes():
    """Generation-aware scoped-VMEM budget (leaves ~25% headroom)."""
    try:
        cap = int(pltpu.get_tpu_info().vmem_capacity_bytes)
    except Exception:
        cap = 64 << 20  # conservative default == v7x per-TC VMEM
    return max(32 << 20, min(cap * 3 // 4, 96 << 20))


def _pick_class_block(n_cls, seq_len, ctx_dim, itemsize, target_block_bytes):
    """Class block sized to ~target_block_bytes of output per grid step.

    No divisibility requirement (grid uses cdiv); capped at ceil(n_cls/2) so the
    'parallel' class axis has >=2 steps for v7x megacore sharding.
    """
    per_class = max(1, seq_len * ctx_dim * itemsize)
    blk = max(1, target_block_bytes // per_class)
    if n_cls >= 2:
        blk = min(blk, pl.cdiv(n_cls, 2))
    return int(min(blk, n_cls))


def prompt_learner_forward(ctx, token_embedding, *, class_block=None,
                           vmem_limit_bytes=None):
    """Pallas PromptLearner.forward() (class_token_position='end', generic ctx).

    ctx:             (n_ctx, ctx_dim)
    token_embedding: (n_cls, seq_len, ctx_dim) frozen embedding; rows [1, 1+n_ctx)
                     are placeholders to be overwritten.
    returns:         (n_cls, seq_len, ctx_dim)
    """
    n_ctx, ctx_dim = ctx.shape
    n_cls, seq_len, emb_dim = token_embedding.shape
    assert emb_dim == ctx_dim
    assert n_ctx >= 1
    assert seq_len >= 1 + n_ctx

    dtype = token_embedding.dtype
    ctx = ctx.astype(dtype)  # frozen-embedding dtype wins, as in the PyTorch module

    if vmem_limit_bytes is None:
        vmem_limit_bytes = _vmem_budget_bytes()
    if class_block is None:
        # Per step: ~2x emb block + ~2x out block (double-buffered) + tiny ctx.
        target_block_bytes = min(16 << 20, max(1 << 20, vmem_limit_bytes // 5))
        class_block = _pick_class_block(
            n_cls, seq_len, ctx_dim, jnp.dtype(dtype).itemsize, target_block_bytes)
    class_block = int(min(class_block, n_cls))
    grid = (pl.cdiv(n_cls, class_block),)  # ragged last block handled by Pallas

    kernel = functools.partial(_assemble_kernel, n_ctx=n_ctx)

    return pl.pallas_call(
        kernel,
        out_shape=jax.ShapeDtypeStruct((n_cls, seq_len, ctx_dim), dtype),
        grid_spec=pltpu.PrefetchScalarGridSpec(
            num_scalar_prefetch=0,
            grid=grid,
            in_specs=[
                # shared (grid-invariant) context block
                pl.BlockSpec((n_ctx, ctx_dim), lambda i: (0, 0)),
                # class-block of the frozen embedding
                pl.BlockSpec((class_block, seq_len, ctx_dim), lambda i: (i, 0, 0)),
            ],
            out_specs=pl.BlockSpec((class_block, seq_len, ctx_dim),
                                   lambda i: (i, 0, 0)),
        ),
        compiler_params=pltpu.CompilerParams(
            dimension_semantics=("parallel",),
            vmem_limit_bytes=int(vmem_limit_bytes),
        ),
    )(ctx, token_embedding)


# ---------------------------------------------------------------------------
# In-place / donated path: only the ctx rows touch HBM (~10-40x less traffic).
# ---------------------------------------------------------------------------
def _inplace_kernel(ctx_ref, emb_hbm_ref, out_hbm_ref, bcast_ref, sem, *, n_ctx):
    del emb_hbm_ref  # aliased with out_hbm_ref; prefix/suffix rows stay untouched
    bcast_ref[...] = jnp.broadcast_to(ctx_ref[...][None, :, :], bcast_ref.shape)
    cp = pltpu.make_async_copy(
        bcast_ref, out_hbm_ref.at[:, pl.ds(1, n_ctx), :], sem)
    cp.start()
    cp.wait()


def prompt_learner_forward_inplace(ctx, token_embedding, *, vmem_limit_bytes=None):
    """Same result as prompt_learner_forward, but aliases the output with the
    embedding buffer and writes ONLY rows [1, 1+n_ctx) via a manual DMA.
    Intended for callers that can donate token_embedding (jit donate_argnums)."""
    n_ctx, ctx_dim = ctx.shape
    n_cls, seq_len, emb_dim = token_embedding.shape
    assert emb_dim == ctx_dim
    assert n_ctx >= 1
    assert seq_len >= 1 + n_ctx

    dtype = token_embedding.dtype
    ctx = ctx.astype(dtype)

    if vmem_limit_bytes is None:
        vmem_limit_bytes = _vmem_budget_bytes()

    bcast_bytes = n_cls * n_ctx * ctx_dim * jnp.dtype(dtype).itemsize
    if bcast_bytes > vmem_limit_bytes // 2:
        # TODO(synk): block the in-place DMA over classes when the broadcast
        # slab outgrows VMEM; fall back to the copy path for now.
        return prompt_learner_forward(ctx, token_embedding,
                                      vmem_limit_bytes=vmem_limit_bytes)

    kernel = functools.partial(_inplace_kernel, n_ctx=n_ctx)

    return pl.pallas_call(
        kernel,
        out_shape=jax.ShapeDtypeStruct((n_cls, seq_len, ctx_dim), dtype),
        grid_spec=pltpu.PrefetchScalarGridSpec(
            num_scalar_prefetch=0,
            grid=(1,),
            in_specs=[
                pl.BlockSpec((n_ctx, ctx_dim), lambda i: (0, 0)),
                pl.BlockSpec(memory_space=pl.ANY),   # embedding stays in HBM
            ],
            out_specs=pl.BlockSpec(memory_space=pl.ANY),
            scratch_shapes=[
                pltpu.VMEM((n_cls, n_ctx, ctx_dim), dtype),
                pltpu.SemaphoreType.DMA,
            ],
        ),
        input_output_aliases={1: 0},
        compiler_params=pltpu.CompilerParams(
            dimension_semantics=("arbitrary",),
            vmem_limit_bytes=int(vmem_limit_bytes),
        ),
    )(ctx, token_embedding)


def prompt_learner_reference(ctx, token_prefix, token_suffix):
    n_cls = token_prefix.shape[0]
    ctx = ctx.astype(token_prefix.dtype)
    ctx_b = jnp.broadcast_to(ctx[None], (n_cls,) + ctx.shape)
    return jnp.concatenate([token_prefix, ctx_b, token_suffix], axis=1)


# TODO(synk): 'middle' and 'front' class_token_position branches (per-class
# variable-length concats driven by name_lens) and CSC per-class contexts are
# not implemented; only the default 'end' layout with a generic context is.


if __name__ == "__main__":
    key = jax.random.PRNGKey(0)
    k_ctx, k_emb, k_ctx2, k_emb2 = jax.random.split(key, 4)

    # --- Test 1: module-faithful configuration (n_cls fixed at 1 in __init__) ---
    n_cls, n_ctx, ctx_dim, seq_len = 1, 4, 128, 16
    ctx = (0.02 * jax.random.normal(k_ctx, (n_ctx, ctx_dim))).astype(jnp.float32)
    embedding = jax.random.normal(k_emb, (n_cls, seq_len, ctx_dim)).astype(jnp.float32)

    out = jax.block_until_ready(prompt_learner_forward(ctx, embedding))
    ref = prompt_learner_reference(ctx, embedding[:, :1, :], embedding[:, 1 + n_ctx:, :])
    assert out.shape == (n_cls, seq_len, ctx_dim)
    assert jnp.array_equal(out, ref)

    # --- Test 2: multi-class, bf16, forced class blocking with a ragged edge ---
    n_cls2, n_ctx2, ctx_dim2, seq_len2 = 5, 4, 256, 16
    ctx2 = (0.02 * jax.random.normal(k_ctx2, (n_ctx2, ctx_dim2))).astype(jnp.float32)
    embedding2 = jax.random.normal(
        k_emb2, (n_cls2, seq_len2, ctx_dim2)).astype(jnp.bfloat16)

    out2 = jax.block_until_ready(
        prompt_learner_forward(ctx2, embedding2, class_block=2))  # grid = cdiv(5,2)=3
    ref2 = prompt_learner_reference(
        ctx2, embedding2[:, :1, :], embedding2[:, 1 + n_ctx2:, :])
    assert out2.shape == (n_cls2, seq_len2, ctx_dim2)
    assert out2.dtype == jnp.bfloat16
    assert jnp.array_equal(out2, ref2)

    # --- Test 3: donated / in-place variant (writes only the ctx rows) ---
    fwd_inplace = jax.jit(prompt_learner_forward_inplace, donate_argnums=(1,))
    emb_donate = jnp.copy(embedding2)
    out3 = jax.block_until_ready(fwd_inplace(ctx2, emb_donate))
    assert out3.shape == (n_cls2, seq_len2, ctx_dim2)
    assert out3.dtype == jnp.bfloat16
    assert jnp.array_equal(out3, ref2)

    print("KERNEL_OK")
</pallas_src>

<mosaic_0001>
module attributes {stable_mosaic.version = 11 : i64} {
  func.func @_assemble_kernel(%arg0: i32, %arg1: memref<4x128xf32, #tpu.memory_space<vmem>>, %arg2: memref<1x16x128xf32, #tpu.memory_space<vmem>>, %arg3: memref<1x16x128xf32, #tpu.memory_space<vmem>>) attributes {dimension_semantics = [#tpu.dimension_semantics<parallel>], iteration_bounds = array<i64: 1>, scalar_prefetch = 0 : i64, scratch_operands = 0 : i64, tpu.core_type = #tpu.core_type<tc>, window_params = [{pipeline_mode = #tpu.pipeline_mode<synchronous>, transform_indices = @transform_0, window_bounds = array<i64: 4, 128>}, {transform_indices = @transform_1, window_bounds = array<i64: 1, 16, 128>}, {transform_indices = @transform_2, window_bounds = array<i64: 1, 16, 128>}]} {
    %c0 = arith.constant 0 : index
    %c0_0 = arith.constant 0 : index
    %c0_1 = arith.constant 0 : index
    %0 = vector.load %arg2[%c0, %c0_0, %c0_1] : memref<1x16x128xf32, #tpu.memory_space<vmem>>, vector<1x16x128xf32>
    %c0_2 = arith.constant 0 : index
    %c0_3 = arith.constant 0 : index
    %c0_4 = arith.constant 0 : index
    %1 = vector.load %arg3[%c0_2, %c0_3, %c0_4] : memref<1x16x128xf32, #tpu.memory_space<vmem>>, vector<1x16x128xf32>
    tpu.vector_store %arg3[%c0_2, %c0_3, %c0_4], %0 {strides = array<i32>} : memref<1x16x128xf32, #tpu.memory_space<vmem>>, vector<1x16x128xf32>,
    %c0_5 = arith.constant 0 : index
    %c0_6 = arith.constant 0 : index
    %2 = vector.load %arg1[%c0_5, %c0_6] : memref<4x128xf32, #tpu.memory_space<vmem>>, vector<4x128xf32>
    %3 = vector.shape_cast %2 : vector<4x128xf32> to vector<1x4x128xf32>
    %c0_7 = arith.constant 0 : index
    %c1 = arith.constant 1 : index
    %c0_8 = arith.constant 0 : index
    %4 = vector.load %arg3[%c0_7, %c1, %c0_8] : memref<1x16x128xf32, #tpu.memory_space<vmem>>, vector<1x4x128xf32>
    tpu.vector_store %arg3[%c0_7, %c1, %c0_8], %3 {strides = array<i32>} : memref<1x16x128xf32, #tpu.memory_space<vmem>>, vector<1x4x128xf32>,
    return
  }
  func.func @transform_0(%arg0: i32) -> (i32, i32) {
    %c0_i32 = arith.constant 0 : i32
    %c0_i32_0 = arith.constant 0 : i32
    %c0_i32_1 = arith.constant 0 : i32
    return %c0_i32, %c0_i32_0 : i32, i32
  }
  func.func @transform_1(%arg0: i32) -> (i32, i32, i32) {
    %c0_i32 = arith.constant 0 : i32
    %c0_i32_0 = arith.constant 0 : i32
    %c0_i32_1 = arith.constant 0 : i32
    return %arg0, %c0_i32, %c0_i32_0 : i32, i32, i32
  }
  func.func @transform_2(%arg0: i32) -> (i32, i32, i32) {
    %c0_i32 = arith.constant 0 : i32
    %c0_i32_0 = arith.constant 0 : i32
    %c0_i32_1 = arith.constant 0 : i32
    return %arg0, %c0_i32, %c0_i32_0 : i32, i32, i32
  }
}

</mosaic_0001>

<bundles_post_ra>
// kernel: tpu_custom_call.1
= control target key start
LH: loop header
LB: loop body
LE: loop exit
PB: predicated region body
PF: predicated region fallthrough
CT: control target
= control target key end

     0   :  { %7 = vsyncpa [#allocation3], 0  ;;  %s208_s0 = inlined_call_operand.hbm [shape: f32[4,128], index: 0, kind: input, shape index: {}]   ;;  %s209_s1 = inlined_call_operand.hbm [shape: f32[1,16,128], index: 1, kind: input, shape index: {}]   ;;  %s210_s2 = inlined_call_operand.hbm [shape: f32[1,16,128], index: 2, kind: output, shape index: {}]  }
   0x1   :  { %8 = vsyncpa [#allocation6], 0 }
   0x2   :  { %9 = vsyncpa [#allocation4], 0  ;;  %s139_s9 = smov [#allocation2]   ;;  %s140_s11 = smov [#allocation5]  }
   0x3   :  { %s16_s10 = sshll.u32 %s139_s9, 4  ;;  %s25_s12 = sshll.u32 %s140_s11, 4  ;;  %s17_s10 = int_to_ptr.vmem [resolvable:$true] %s16_s10  ;;  %s159_s12 = int_to_ptr.vmem [resolvable:$true] %s25_s12 }
   0x4   :  { %s67_s15 = scalar_lea.hbm %s208_s0, 64 }
   0x5   :  { %p68_p0 = scmp.ne.s32.totalorder %s208_s0, %s67_s15  ;;  %p71_p1 = scmp.lt.u32.totalorder %s67_s15, %s208_s0 }
   0x7   :  { %p73_p2 = pnand %p71_p1, %p68_p0 }
   0x9   :  { %76 = shalt.err (!%p73_p2)
}
   0xa   :  { %s77_s20 = scalar_lea.vmem %s17_s10, 64  ;;  %p82_p4 = scmp.lt.s32.totalorder %s17_s10, %s17_s10 }
   0xb   :  { %p78_p3 = scmp.ne.s32.totalorder %s17_s10, %s77_s20  ;;  %p83_p5 = scmp.lt.s32.totalorder %s77_s20, %s77_s20 }
   0xd   :  { %p84_p6 = por %p83_p5, %p82_p4 }
   0xf   :  { %p85_p7 = pnand %p84_p6, %p78_p3 }
  0x11   :  { %88 = shalt.err (!%p85_p7)
}
  0x12   :  { %19 = dma.hbm_to_vmem [thread:$0]  %s208_s0, 64, %s17_s10, [#allocation3]  }
  0x13   :  { %s89_s25 = scalar_lea.hbm %s209_s1, 256 }
  0x14   :  { %p90_p8 = scmp.ne.s32.totalorder %s209_s1, %s89_s25  ;;  %p93_p9 = scmp.lt.u32.totalorder %s89_s25, %s209_s1 }
  0x16   :  { %p95_p10 = pnand %p93_p9, %p90_p8 }
  0x18   :  { %98 = shalt.err (!%p95_p10)
}
  0x19   :  { %s99_s30 = scalar_lea.vmem %s159_s12, 256  ;;  %p104_p12 = scmp.lt.s32.totalorder %s159_s12, %s159_s12 }
  0x1a   :  { %p100_p11 = scmp.ne.s32.totalorder %s159_s12, %s99_s30  ;;  %p105_p13 = scmp.lt.s32.totalorder %s99_s30, %s99_s30 }
  0x1c   :  { %p106_p0 = por %p105_p13, %p104_p12 }
  0x1e   :  { %p107_p1 = pnand %p106_p0, %p100_p11 }
  0x20   :  { %110 = shalt.err (!%p107_p1)
}
  0x21   :  { %s141_s0 = smov 128   ;;  %s142_s3 = smov 8  }
  0x22   :  { %31 = dma.hbm_to_vmem [thread:$0]  %s209_s1, 256, %s159_s12, [#allocation6], %s141_s0, %s141_s0, %s142_s3  }
  0x23   :  { %133 = dma.done.wait [#allocation3], 64  }
  0x24   :  { %134 = vsyncadd [#allocation3], 4294967232 }
  0x25   :  { %135 = dma.done.wait [#allocation6], 256  }
  0x26   :  { %136 = vsyncadd [#allocation6], 4294967040  ;;  %s143_s6 = smov [#allocation7]   ;;  %v38_v0 = vld [vmem:[#allocation5] sm:$0xff]  ;;  %v39_v1 = vld [vmem:[#allocation5 + $0x8] sm:$0xff] }
  0x27   :  { %s49_s7 = sshll.u32 %s143_s6, 4  ;;  %v42_v2 = vld [vmem:[#allocation2] sm:$0xf]  ;;  %40 = vst [vmem:[#allocation7] sm:$0xff] %v38_v0  ;;  %41 = vst [vmem:[#allocation7 + $0x8] sm:$0xff] %v39_v1  ;;  %s50_s7 = int_to_ptr.vmem [resolvable:$true] %s49_s7 }
  0x28   :  { %43 = vst [vmem:[#allocation7 + $0x1] sm:$0xf] %v42_v2  ;;  %s111_s8 = scalar_lea.vmem %s50_s7, 256  ;;  %p116_p3 = scmp.lt.s32.totalorder %s50_s7, %s50_s7 }
  0x29   :  { %p112_p2 = scmp.ne.s32.totalorder %s50_s7, %s111_s8  ;;  %p117_p4 = scmp.lt.s32.totalorder %s111_s8, %s111_s8 }
  0x2b   :  { %p118_p5 = por %p117_p4, %p116_p3 }
  0x2d   :  { %p119_p6 = pnand %p118_p5, %p112_p2 }
  0x2f   :  { %122 = shalt.err (!%p119_p6)
}
  0x30   :  { %s123_s10 = scalar_lea.hbm %s210_s2, 256 }
  0x31   :  { %p124_p7 = scmp.ne.s32.totalorder %s210_s2, %s123_s10  ;;  %p127_p8 = scmp.lt.u32.totalorder %s123_s10, %s210_s2 }
  0x33   :  { %p129_p9 = pnand %p127_p8, %p124_p7 }
  0x35   :  { %132 = shalt.err (!%p129_p9)
}
  0x36   :  { %55 = dma.vmem_to_hbm [thread:$0]  %s50_s7, 256, %s210_s2, [#allocation4], %s141_s0, %s141_s0, %s142_s3  }
  0x37   :  { %137 = dma.done.wait [#allocation4], 256  }
  0x38   :  { %138 = vsyncadd [#allocation4], 4294967040 }
  0x39   :  { %59 = vsyncpa [#allocation3], 1 }
  0x3a   :  { %60 = vsyncpa [#allocation6], 1 }
  0x3b   :  { %61 = vsyncpa [#allocation4], 1 }

</bundles_post_ra>
